<compile_context>
chip_gen: v7x
topology: tpu7x:2x2x1
jax: 0.10.0
libtpu: 0.0.40
codegen_flags: <defaults>
</compile_context>

<pallas_src>
import functools

import jax
import jax.numpy as jnp
from jax.experimental import pallas as pl
from jax.experimental.pallas import tpu as pltpu


def gru_linear_kernel(x_ref,                 # (T*B, I)  time-major flat input
                      w_i_ref,               # (I, 3H)   fused input weights  [r|z|n]
                      w_h_ref,               # (H, 3H)   fused hidden weights [r|z|n]
                      b_x_ref,               # (1, 3H)   [b_ir+b_hr | b_iz+b_hz | b_in]
                      b_hn_ref,              # (1, H)    stays inside r * (...)
                      w_lin_ref, b_lin_ref,  # (H, O), (1, O)
                      out_ref,               # (B, O)
                      *, seq_len, batch):
    T, B = seq_len, batch
    H = w_h_ref.shape[0]

    # Hoisted input projection: one well-shaped MXU matmul, off the serial
    # recurrence path.  Biases that don't sit inside the r-scaled term are
    # folded in here too.
    xw = (jnp.dot(x_ref[...], w_i_ref[...], preferred_element_type=jnp.float32)
          + b_x_ref[...])                                   # (T*B, 3H)

    w_h = w_h_ref[...]
    b_hn = b_hn_ref[...]

    h = jnp.zeros((B, H), jnp.float32)
    # T is static and small: fully unroll so neighbouring steps' elementwise
    # work can hide the per-step MXU/EUP latency.
    for t in range(T):
        gx = xw[t * B:(t + 1) * B, :]                        # (B, 3H) precomputed
        gh = jnp.dot(h, w_h, preferred_element_type=jnp.float32)  # one MXU push/step
        rz = jax.nn.sigmoid(gx[:, :2 * H] + gh[:, :2 * H])   # one EUP pass for r|z
        r = rz[:, :H]
        z = rz[:, H:]
        n = jnp.tanh(gx[:, 2 * H:] + r * (gh[:, 2 * H:] + b_hn))
        h = (1.0 - z) * n + z * h

    out_ref[...] = (jnp.dot(h, w_lin_ref[...], preferred_element_type=jnp.float32)
                    + b_lin_ref[...])


@jax.jit
def gru_weather_forward(x, params):
    """x: (B, T, I) float32, batch_first like the PyTorch module."""
    B, T, I = x.shape
    O = params["w_lin"].shape[1]

    # Time-major flat layout (row = t*B + b), done in XLA so the kernel never
    # reshapes x and the hoisted projection is a single 2-D matmul.
    x_flat = jnp.transpose(x, (1, 0, 2)).reshape(T * B, I)

    vmem = pl.BlockSpec(memory_space=pltpu.MemorySpace.VMEM)
    kernel = functools.partial(gru_linear_kernel, seq_len=T, batch=B)

    # Whole problem is VMEM-resident at these sizes.
    # TODO(synk): for production batch / sequence lengths, add a batch-parallel
    # grid axis (dimension_semantics=("parallel",)) and tile/pipeline over T so
    # the sequence streams through VMEM instead of living there whole (v7x has
    # only 64 MiB VMEM and 2 TensorCores).
    return pl.pallas_call(
        kernel,
        out_shape=jax.ShapeDtypeStruct((B, O), jnp.float32),
        in_specs=[vmem] * 7,
        out_specs=vmem,
        compiler_params=pltpu.CompilerParams(vmem_limit_bytes=64 * 1024 * 1024),
    )(x_flat, params["w_i"], params["w_h"], params["b_x"], params["b_hn"],
      params["w_lin"], params["b_lin"])


def init_params(key, input_size, hidden_size, output_size):
    """Deterministic synthetic init, PyTorch-style U(-1/sqrt(H), 1/sqrt(H)),
    packed into the fused layout the kernel consumes (gate order r|z|n)."""
    H = hidden_size
    k = 1.0 / jnp.sqrt(jnp.float32(H))
    keys = jax.random.split(key, 16)
    u = lambda kk, shape: jax.random.uniform(kk, shape, jnp.float32, -k, k)

    w_ir, w_iz, w_in = (u(keys[0], (input_size, H)),
                        u(keys[1], (input_size, H)),
                        u(keys[2], (input_size, H)))
    w_hr, w_hz, w_hn = (u(keys[3], (H, H)), u(keys[4], (H, H)), u(keys[5], (H, H)))
    b_ir, b_iz, b_in = (u(keys[6], (1, H)), u(keys[7], (1, H)), u(keys[8], (1, H)))
    b_hr, b_hz, b_hn = (u(keys[9], (1, H)), u(keys[10], (1, H)), u(keys[11], (1, H)))
    w_lin = u(keys[12], (H, output_size))
    b_lin = u(keys[13], (1, output_size))

    return dict(
        w_i=jnp.concatenate([w_ir, w_iz, w_in], axis=1),                 # (I, 3H)
        w_h=jnp.concatenate([w_hr, w_hz, w_hn], axis=1),                 # (H, 3H)
        b_x=jnp.concatenate([b_ir + b_hr, b_iz + b_hz, b_in], axis=1),   # (1, 3H)
        b_hn=b_hn,                                                       # (1, H)
        w_lin=w_lin, b_lin=b_lin,
    )


def gru_weather_reference(x, p):
    """Pure-JAX reference replicating torch.nn.GRU + Linear semantics."""
    B, T, _ = x.shape
    H = p["w_h"].shape[0]
    w_ir, w_iz, w_in = p["w_i"][:, :H], p["w_i"][:, H:2 * H], p["w_i"][:, 2 * H:]
    w_hr, w_hz, w_hn = p["w_h"][:, :H], p["w_h"][:, H:2 * H], p["w_h"][:, 2 * H:]
    b_r, b_z, b_in = p["b_x"][:, :H], p["b_x"][:, H:2 * H], p["b_x"][:, 2 * H:]
    h = jnp.zeros((B, H), jnp.float32)
    for t in range(T):
        x_t = x[:, t, :]
        r = jax.nn.sigmoid(x_t @ w_ir + h @ w_hr + b_r)
        z = jax.nn.sigmoid(x_t @ w_iz + h @ w_hz + b_z)
        n = jnp.tanh(x_t @ w_in + b_in + r * (h @ w_hn + p["b_hn"]))
        h = (1.0 - z) * n + z * h
    return h @ p["w_lin"] + p["b_lin"]


if __name__ == "__main__":
    # Small shapes consistent with the module's forward:
    #   x: (batch, seq, input_size); output: (batch, output_size)
    batch, seq_len, input_size = 2, 8, 4
    hidden_size, output_size = 32, 4

    key = jax.random.PRNGKey(0)
    k_x, k_p = jax.random.split(key)
    x = jax.random.normal(k_x, (batch, seq_len, input_size), jnp.float32)
    params = init_params(k_p, input_size, hidden_size, output_size)

    out = jax.block_until_ready(gru_weather_forward(x, params))

    ref = gru_weather_reference(x, params)
    assert out.shape == (batch, output_size)
    assert jnp.allclose(out, ref, atol=1e-5, rtol=1e-5), "mismatch vs reference"

    print("KERNEL_OK")
</pallas_src>

<mosaic_0001>
module attributes {stable_mosaic.version = 11 : i64} {
  func.func @gru_linear_kernel(%arg0: memref<16x4xf32, #tpu.memory_space<vmem>>, %arg1: memref<4x96xf32, #tpu.memory_space<vmem>>, %arg2: memref<32x96xf32, #tpu.memory_space<vmem>>, %arg3: memref<1x96xf32, #tpu.memory_space<vmem>>, %arg4: memref<1x32xf32, #tpu.memory_space<vmem>>, %arg5: memref<32x4xf32, #tpu.memory_space<vmem>>, %arg6: memref<1x4xf32, #tpu.memory_space<vmem>>, %arg7: memref<2x4xf32, #tpu.memory_space<vmem>>) attributes {dimension_semantics = [], scalar_prefetch = 0 : i64, scratch_operands = 0 : i64, tpu.core_type = #tpu.core_type<tc>} {
    %c0 = arith.constant 0 : index
    %c0_0 = arith.constant 0 : index
    %0 = vector.load %arg0[%c0, %c0_0] : memref<16x4xf32, #tpu.memory_space<vmem>>, vector<16x4xf32>
    %c0_1 = arith.constant 0 : index
    %c0_2 = arith.constant 0 : index
    %1 = vector.load %arg1[%c0_1, %c0_2] : memref<4x96xf32, #tpu.memory_space<vmem>>, vector<4x96xf32>
    %cst = arith.constant dense<0.000000e+00> : vector<16x96xf32>
    %2 = tpu.matmul %0, %1, %cst {dimension_numbers = #tpu.dot_dimension_numbers<[1], [0], [0], [1], [0, 0, 1, 1], [], []>} : vector<16x4xf32>, vector<4x96xf32>, vector<16x96xf32> -> vector<16x96xf32>
    %c0_3 = arith.constant 0 : index
    %c0_4 = arith.constant 0 : index
    %3 = vector.load %arg3[%c0_3, %c0_4] : memref<1x96xf32, #tpu.memory_space<vmem>>, vector<1x96xf32>
    %4 = vector.broadcast %3 : vector<1x96xf32> to vector<16x96xf32>
    %5 = arith.addf %2, %4 : vector<16x96xf32>
    %c0_5 = arith.constant 0 : index
    %c0_6 = arith.constant 0 : index
    %6 = vector.load %arg2[%c0_5, %c0_6] : memref<32x96xf32, #tpu.memory_space<vmem>>, vector<32x96xf32>
    %c0_7 = arith.constant 0 : index
    %c0_8 = arith.constant 0 : index
    %7 = vector.load %arg4[%c0_7, %c0_8] : memref<1x32xf32, #tpu.memory_space<vmem>>, vector<1x32xf32>
    %cst_9 = arith.constant 0.000000e+00 : f32
    %8 = vector.broadcast %cst_9 : f32 to vector<2x32xf32>
    %9 = vector.extract_strided_slice %5 {offsets = [0, 0], sizes = [2, 96], strides = [1, 1]} : vector<16x96xf32> to vector<2x96xf32>
    %cst_10 = arith.constant dense<0.000000e+00> : vector<2x96xf32>
    %10 = tpu.matmul %8, %6, %cst_10 {dimension_numbers = #tpu.dot_dimension_numbers<[1], [0], [0], [1], [0, 0, 1, 1], [], []>} : vector<2x32xf32>, vector<32x96xf32>, vector<2x96xf32> -> vector<2x96xf32>
    %11 = vector.extract_strided_slice %9 {offsets = [0, 0], sizes = [2, 64], strides = [1, 1]} : vector<2x96xf32> to vector<2x64xf32>
    %12 = vector.extract_strided_slice %10 {offsets = [0, 0], sizes = [2, 64], strides = [1, 1]} : vector<2x96xf32> to vector<2x64xf32>
    %13 = arith.addf %11, %12 : vector<2x64xf32>
    %14 = arith.negf %13 : vector<2x64xf32>
    %15 = math.exp %14 : vector<2x64xf32>
    %cst_11 = arith.constant 1.000000e+00 : f32
    %16 = vector.broadcast %cst_11 : f32 to vector<2x64xf32>
    %17 = arith.addf %16, %15 : vector<2x64xf32>
    %18 = arith.divf %16, %17 : vector<2x64xf32>
    %19 = vector.extract_strided_slice %18 {offsets = [0, 0], sizes = [2, 32], strides = [1, 1]} : vector<2x64xf32> to vector<2x32xf32>
    %20 = vector.extract_strided_slice %18 {offsets = [0, 32], sizes = [2, 32], strides = [1, 1]} : vector<2x64xf32> to vector<2x32xf32>
    %21 = vector.extract_strided_slice %9 {offsets = [0, 64], sizes = [2, 32], strides = [1, 1]} : vector<2x96xf32> to vector<2x32xf32>
    %22 = vector.extract_strided_slice %10 {offsets = [0, 64], sizes = [2, 32], strides = [1, 1]} : vector<2x96xf32> to vector<2x32xf32>
    %23 = vector.broadcast %7 : vector<1x32xf32> to vector<2x32xf32>
    %24 = arith.addf %22, %23 : vector<2x32xf32>
    %25 = arith.mulf %19, %24 : vector<2x32xf32>
    %26 = arith.addf %21, %25 : vector<2x32xf32>
    %27 = math.tanh %26 : vector<2x32xf32>
    %cst_12 = arith.constant 1.000000e+00 : f32
    %28 = vector.broadcast %cst_12 : f32 to vector<2x32xf32>
    %29 = arith.subf %28, %20 : vector<2x32xf32>
    %30 = arith.mulf %29, %27 : vector<2x32xf32>
    %31 = arith.mulf %20, %8 : vector<2x32xf32>
    %32 = arith.addf %30, %31 : vector<2x32xf32>
    %33 = vector.extract_strided_slice %5 {offsets = [2, 0], sizes = [2, 96], strides = [1, 1]} : vector<16x96xf32> to vector<2x96xf32>
    %cst_13 = arith.constant dense<0.000000e+00> : vector<2x96xf32>
    %34 = tpu.matmul %32, %6, %cst_13 {dimension_numbers = #tpu.dot_dimension_numbers<[1], [0], [0], [1], [0, 0, 1, 1], [], []>} : vector<2x32xf32>, vector<32x96xf32>, vector<2x96xf32> -> vector<2x96xf32>
    %35 = vector.extract_strided_slice %33 {offsets = [0, 0], sizes = [2, 64], strides = [1, 1]} : vector<2x96xf32> to vector<2x64xf32>
    %36 = vector.extract_strided_slice %34 {offsets = [0, 0], sizes = [2, 64], strides = [1, 1]} : vector<2x96xf32> to vector<2x64xf32>
    %37 = arith.addf %35, %36 : vector<2x64xf32>
    %38 = arith.negf %37 : vector<2x64xf32>
    %39 = math.exp %38 : vector<2x64xf32>
    %cst_14 = arith.constant 1.000000e+00 : f32
    %40 = vector.broadcast %cst_14 : f32 to vector<2x64xf32>
    %41 = arith.addf %40, %39 : vector<2x64xf32>
    %42 = arith.divf %40, %41 : vector<2x64xf32>
    %43 = vector.extract_strided_slice %42 {offsets = [0, 0], sizes = [2, 32], strides = [1, 1]} : vector<2x64xf32> to vector<2x32xf32>
    %44 = vector.extract_strided_slice %42 {offsets = [0, 32], sizes = [2, 32], strides = [1, 1]} : vector<2x64xf32> to vector<2x32xf32>
    %45 = vector.extract_strided_slice %33 {offsets = [0, 64], sizes = [2, 32], strides = [1, 1]} : vector<2x96xf32> to vector<2x32xf32>
    %46 = vector.extract_strided_slice %34 {offsets = [0, 64], sizes = [2, 32], strides = [1, 1]} : vector<2x96xf32> to vector<2x32xf32>
    %47 = vector.broadcast %7 : vector<1x32xf32> to vector<2x32xf32>
    %48 = arith.addf %46, %47 : vector<2x32xf32>
    %49 = arith.mulf %43, %48 : vector<2x32xf32>
    %50 = arith.addf %45, %49 : vector<2x32xf32>
    %51 = math.tanh %50 : vector<2x32xf32>
    %cst_15 = arith.constant 1.000000e+00 : f32
    %52 = vector.broadcast %cst_15 : f32 to vector<2x32xf32>
    %53 = arith.subf %52, %44 : vector<2x32xf32>
    %54 = arith.mulf %53, %51 : vector<2x32xf32>
    %55 = arith.mulf %44, %32 : vector<2x32xf32>
    %56 = arith.addf %54, %55 : vector<2x32xf32>
    %57 = vector.extract_strided_slice %5 {offsets = [4, 0], sizes = [2, 96], strides = [1, 1]} : vector<16x96xf32> to vector<2x96xf32>
    %cst_16 = arith.constant dense<0.000000e+00> : vector<2x96xf32>
    %58 = tpu.matmul %56, %6, %cst_16 {dimension_numbers = #tpu.dot_dimension_numbers<[1], [0], [0], [1], [0, 0, 1, 1], [], []>} : vector<2x32xf32>, vector<32x96xf32>, vector<2x96xf32> -> vector<2x96xf32>
    %59 = vector.extract_strided_slice %57 {offsets = [0, 0], sizes = [2, 64], strides = [1, 1]} : vector<2x96xf32> to vector<2x64xf32>
    %60 = vector.extract_strided_slice %58 {offsets = [0, 0], sizes = [2, 64], strides = [1, 1]} : vector<2x96xf32> to vector<2x64xf32>
    %61 = arith.addf %59, %60 : vector<2x64xf32>
    %62 = arith.negf %61 : vector<2x64xf32>
    %63 = math.exp %62 : vector<2x64xf32>
    %cst_17 = arith.constant 1.000000e+00 : f32
    %64 = vector.broadcast %cst_17 : f32 to vector<2x64xf32>
    %65 = arith.addf %64, %63 : vector<2x64xf32>
    %66 = arith.divf %64, %65 : vector<2x64xf32>
    %67 = vector.extract_strided_slice %66 {offsets = [0, 0], sizes = [2, 32], strides = [1, 1]} : vector<2x64xf32> to vector<2x32xf32>
    %68 = vector.extract_strided_slice %66 {offsets = [0, 32], sizes = [2, 32], strides = [1, 1]} : vector<2x64xf32> to vector<2x32xf32>
    %69 = vector.extract_strided_slice %57 {offsets = [0, 64], sizes = [2, 32], strides = [1, 1]} : vector<2x96xf32> to vector<2x32xf32>
    %70 = vector.extract_strided_slice %58 {offsets = [0, 64], sizes = [2, 32], strides = [1, 1]} : vector<2x96xf32> to vector<2x32xf32>
    %71 = vector.broadcast %7 : vector<1x32xf32> to vector<2x32xf32>
    %72 = arith.addf %70, %71 : vector<2x32xf32>
    %73 = arith.mulf %67, %72 : vector<2x32xf32>
    %74 = arith.addf %69, %73 : vector<2x32xf32>
    %75 = math.tanh %74 : vector<2x32xf32>
    %cst_18 = arith.constant 1.000000e+00 : f32
    %76 = vector.broadcast %cst_18 : f32 to vector<2x32xf32>
    %77 = arith.subf %76, %68 : vector<2x32xf32>
    %78 = arith.mulf %77, %75 : vector<2x32xf32>
    %79 = arith.mulf %68, %56 : vector<2x32xf32>
    %80 = arith.addf %78, %79 : vector<2x32xf32>
    %81 = vector.extract_strided_slice %5 {offsets = [6, 0], sizes = [2, 96], strides = [1, 1]} : vector<16x96xf32> to vector<2x96xf32>
    %cst_19 = arith.constant dense<0.000000e+00> : vector<2x96xf32>
    %82 = tpu.matmul %80, %6, %cst_19 {dimension_numbers = #tpu.dot_dimension_numbers<[1], [0], [0], [1], [0, 0, 1, 1], [], []>} : vector<2x32xf32>, vector<32x96xf32>, vector<2x96xf32> -> vector<2x96xf32>
    %83 = vector.extract_strided_slice %81 {offsets = [0, 0], sizes = [2, 64], strides = [1, 1]} : vector<2x96xf32> to vector<2x64xf32>
    %84 = vector.extract_strided_slice %82 {offsets = [0, 0], sizes = [2, 64], strides = [1, 1]} : vector<2x96xf32> to vector<2x64xf32>
    %85 = arith.addf %83, %84 : vector<2x64xf32>
    %86 = arith.negf %85 : vector<2x64xf32>
    %87 = math.exp %86 : vector<2x64xf32>
    %cst_20 = arith.constant 1.000000e+00 : f32
    %88 = vector.broadcast %cst_20 : f32 to vector<2x64xf32>
    %89 = arith.addf %88, %87 : vector<2x64xf32>
    %90 = arith.divf %88, %89 : vector<2x64xf32>
    %91 = vector.extract_strided_slice %90 {offsets = [0, 0], sizes = [2, 32], strides = [1, 1]} : vector<2x64xf32> to vector<2x32xf32>
    %92 = vector.extract_strided_slice %90 {offsets = [0, 32], sizes = [2, 32], strides = [1, 1]} : vector<2x64xf32> to vector<2x32xf32>
    %93 = vector.extract_strided_slice %81 {offsets = [0, 64], sizes = [2, 32], strides = [1, 1]} : vector<2x96xf32> to vector<2x32xf32>
    %94 = vector.extract_strided_slice %82 {offsets = [0, 64], sizes = [2, 32], strides = [1, 1]} : vector<2x96xf32> to vector<2x32xf32>
    %95 = vector.broadcast %7 : vector<1x32xf32> to vector<2x32xf32>
    %96 = arith.addf %94, %95 : vector<2x32xf32>
    %97 = arith.mulf %91, %96 : vector<2x32xf32>
    %98 = arith.addf %93, %97 : vector<2x32xf32>
    %99 = math.tanh %98 : vector<2x32xf32>
    %cst_21 = arith.constant 1.000000e+00 : f32
    %100 = vector.broadcast %cst_21 : f32 to vector<2x32xf32>
    %101 = arith.subf %100, %92 : vector<2x32xf32>
    %102 = arith.mulf %101, %99 : vector<2x32xf32>
    %103 = arith.mulf %92, %80 : vector<2x32xf32>
    %104 = arith.addf %102, %103 : vector<2x32xf32>
    %105 = vector.extract_strided_slice %5 {offsets = [8, 0], sizes = [2, 96], strides = [1, 1]} : vector<16x96xf32> to vector<2x96xf32>
    %cst_22 = arith.constant dense<0.000000e+00> : vector<2x96xf32>
    %106 = tpu.matmul %104, %6, %cst_22 {dimension_numbers = #tpu.dot_dimension_numbers<[1], [0], [0], [1], [0, 0, 1, 1], [], []>} : vector<2x32xf32>, vector<32x96xf32>, vector<2x96xf32> -> vector<2x96xf32>
    %107 = vector.extract_strided_slice %105 {offsets = [0, 0], sizes = [2, 64], strides = [1, 1]} : vector<2x96xf32> to vector<2x64xf32>
    %108 = vector.extract_strided_slice %106 {offsets = [0, 0], sizes = [2, 64], strides = [1, 1]} : vector<2x96xf32> to vector<2x64xf32>
    %109 = arith.addf %107, %108 : vector<2x64xf32>
    %110 = arith.negf %109 : vector<2x64xf32>
    %111 = math.exp %110 : vector<2x64xf32>
    %cst_23 = arith.constant 1.000000e+00 : f32
    %112 = vector.broadcast %cst_23 : f32 to vector<2x64xf32>
    %113 = arith.addf %112, %111 : vector<2x64xf32>
    %114 = arith.divf %112, %113 : vector<2x64xf32>
    %115 = vector.extract_strided_slice %114 {offsets = [0, 0], sizes = [2, 32], strides = [1, 1]} : vector<2x64xf32> to vector<2x32xf32>
    %116 = vector.extract_strided_slice %114 {offsets = [0, 32], sizes = [2, 32], strides = [1, 1]} : vector<2x64xf32> to vector<2x32xf32>
    %117 = vector.extract_strided_slice %105 {offsets = [0, 64], sizes = [2, 32], strides = [1, 1]} : vector<2x96xf32> to vector<2x32xf32>
    %118 = vector.extract_strided_slice %106 {offsets = [0, 64], sizes = [2, 32], strides = [1, 1]} : vector<2x96xf32> to vector<2x32xf32>
    %119 = vector.broadcast %7 : vector<1x32xf32> to vector<2x32xf32>
    %120 = arith.addf %118, %119 : vector<2x32xf32>
    %121 = arith.mulf %115, %120 : vector<2x32xf32>
    %122 = arith.addf %117, %121 : vector<2x32xf32>
    %123 = math.tanh %122 : vector<2x32xf32>
    %cst_24 = arith.constant 1.000000e+00 : f32
    %124 = vector.broadcast %cst_24 : f32 to vector<2x32xf32>
    %125 = arith.subf %124, %116 : vector<2x32xf32>
    %126 = arith.mulf %125, %123 : vector<2x32xf32>
    %127 = arith.mulf %116, %104 : vector<2x32xf32>
    %128 = arith.addf %126, %127 : vector<2x32xf32>
    %129 = vector.extract_strided_slice %5 {offsets = [10, 0], sizes = [2, 96], strides = [1, 1]} : vector<16x96xf32> to vector<2x96xf32>
    %cst_25 = arith.constant dense<0.000000e+00> : vector<2x96xf32>
    %130 = tpu.matmul %128, %6, %cst_25 {dimension_numbers = #tpu.dot_dimension_numbers<[1], [0], [0], [1], [0, 0, 1, 1], [], []>} : vector<2x32xf32>, vector<32x96xf32>, vector<2x96xf32> -> vector<2x96xf32>
    %131 = vector.extract_strided_slice %129 {offsets = [0, 0], sizes = [2, 64], strides = [1, 1]} : vector<2x96xf32> to vector<2x64xf32>
    %132 = vector.extract_strided_slice %130 {offsets = [0, 0], sizes = [2, 64], strides = [1, 1]} : vector<2x96xf32> to vector<2x64xf32>
    %133 = arith.addf %131, %132 : vector<2x64xf32>
    %134 = arith.negf %133 : vector<2x64xf32>
    %135 = math.exp %134 : vector<2x64xf32>
    %cst_26 = arith.constant 1.000000e+00 : f32
    %136 = vector.broadcast %cst_26 : f32 to vector<2x64xf32>
    %137 = arith.addf %136, %135 : vector<2x64xf32>
    %138 = arith.divf %136, %137 : vector<2x64xf32>
    %139 = vector.extract_strided_slice %138 {offsets = [0, 0], sizes = [2, 32], strides = [1, 1]} : vector<2x64xf32> to vector<2x32xf32>
    %140 = vector.extract_strided_slice %138 {offsets = [0, 32], sizes = [2, 32], strides = [1, 1]} : vector<2x64xf32> to vector<2x32xf32>
    %141 = vector.extract_strided_slice %129 {offsets = [0, 64], sizes = [2, 32], strides = [1, 1]} : vector<2x96xf32> to vector<2x32xf32>
    %142 = vector.extract_strided_slice %130 {offsets = [0, 64], sizes = [2, 32], strides = [1, 1]} : vector<2x96xf32> to vector<2x32xf32>
    %143 = vector.broadcast %7 : vector<1x32xf32> to vector<2x32xf32>
    %144 = arith.addf %142, %143 : vector<2x32xf32>
    %145 = arith.mulf %139, %144 : vector<2x32xf32>
    %146 = arith.addf %141, %145 : vector<2x32xf32>
    %147 = math.tanh %146 : vector<2x32xf32>
    %cst_27 = arith.constant 1.000000e+00 : f32
    %148 = vector.broadcast %cst_27 : f32 to vector<2x32xf32>
    %149 = arith.subf %148, %140 : vector<2x32xf32>
    %150 = arith.mulf %149, %147 : vector<2x32xf32>
    %151 = arith.mulf %140, %128 : vector<2x32xf32>
    %152 = arith.addf %150, %151 : vector<2x32xf32>
    %153 = vector.extract_strided_slice %5 {offsets = [12, 0], sizes = [2, 96], strides = [1, 1]} : vector<16x96xf32> to vector<2x96xf32>
    %cst_28 = arith.constant dense<0.000000e+00> : vector<2x96xf32>
    %154 = tpu.matmul %152, %6, %cst_28 {dimension_numbers = #tpu.dot_dimension_numbers<[1], [0], [0], [1], [0, 0, 1, 1], [], []>} : vector<2x32xf32>, vector<32x96xf32>, vector<2x96xf32> -> vector<2x96xf32>
    %155 = vector.extract_strided_slice %153 {offsets = [0, 0], sizes = [2, 64], strides = [1, 1]} : vector<2x96xf32> to vector<2x64xf32>
    %156 = vector.extract_strided_slice %154 {offsets = [0, 0], sizes = [2, 64], strides = [1, 1]} : vector<2x96xf32> to vector<2x64xf32>
    %157 = arith.addf %155, %156 : vector<2x64xf32>
    %158 = arith.negf %157 : vector<2x64xf32>
    %159 = math.exp %158 : vector<2x64xf32>
    %cst_29 = arith.constant 1.000000e+00 : f32
    %160 = vector.broadcast %cst_29 : f32 to vector<2x64xf32>
    %161 = arith.addf %160, %159 : vector<2x64xf32>
    %162 = arith.divf %160, %161 : vector<2x64xf32>
    %163 = vector.extract_strided_slice %162 {offsets = [0, 0], sizes = [2, 32], strides = [1, 1]} : vector<2x64xf32> to vector<2x32xf32>
    %164 = vector.extract_strided_slice %162 {offsets = [0, 32], sizes = [2, 32], strides = [1, 1]} : vector<2x64xf32> to vector<2x32xf32>
    %165 = vector.extract_strided_slice %153 {offsets = [0, 64], sizes = [2, 32], strides = [1, 1]} : vector<2x96xf32> to vector<2x32xf32>
    %166 = vector.extract_strided_slice %154 {offsets = [0, 64], sizes = [2, 32], strides = [1, 1]} : vector<2x96xf32> to vector<2x32xf32>
    %167 = vector.broadcast %7 : vector<1x32xf32> to vector<2x32xf32>
    %168 = arith.addf %166, %167 : vector<2x32xf32>
    %169 = arith.mulf %163, %168 : vector<2x32xf32>
    %170 = arith.addf %165, %169 : vector<2x32xf32>
    %171 = math.tanh %170 : vector<2x32xf32>
    %cst_30 = arith.constant 1.000000e+00 : f32
    %172 = vector.broadcast %cst_30 : f32 to vector<2x32xf32>
    %173 = arith.subf %172, %164 : vector<2x32xf32>
    %174 = arith.mulf %173, %171 : vector<2x32xf32>
    %175 = arith.mulf %164, %152 : vector<2x32xf32>
    %176 = arith.addf %174, %175 : vector<2x32xf32>
    %177 = vector.extract_strided_slice %5 {offsets = [14, 0], sizes = [2, 96], strides = [1, 1]} : vector<16x96xf32> to vector<2x96xf32>
    %cst_31 = arith.constant dense<0.000000e+00> : vector<2x96xf32>
    %178 = tpu.matmul %176, %6, %cst_31 {dimension_numbers = #tpu.dot_dimension_numbers<[1], [0], [0], [1], [0, 0, 1, 1], [], []>} : vector<2x32xf32>, vector<32x96xf32>, vector<2x96xf32> -> vector<2x96xf32>
    %179 = vector.extract_strided_slice %177 {offsets = [0, 0], sizes = [2, 64], strides = [1, 1]} : vector<2x96xf32> to vector<2x64xf32>
    %180 = vector.extract_strided_slice %178 {offsets = [0, 0], sizes = [2, 64], strides = [1, 1]} : vector<2x96xf32> to vector<2x64xf32>
    %181 = arith.addf %179, %180 : vector<2x64xf32>
    %182 = arith.negf %181 : vector<2x64xf32>
    %183 = math.exp %182 : vector<2x64xf32>
    %cst_32 = arith.constant 1.000000e+00 : f32
    %184 = vector.broadcast %cst_32 : f32 to vector<2x64xf32>
    %185 = arith.addf %184, %183 : vector<2x64xf32>
    %186 = arith.divf %184, %185 : vector<2x64xf32>
    %187 = vector.extract_strided_slice %186 {offsets = [0, 0], sizes = [2, 32], strides = [1, 1]} : vector<2x64xf32> to vector<2x32xf32>
    %188 = vector.extract_strided_slice %186 {offsets = [0, 32], sizes = [2, 32], strides = [1, 1]} : vector<2x64xf32> to vector<2x32xf32>
    %189 = vector.extract_strided_slice %177 {offsets = [0, 64], sizes = [2, 32], strides = [1, 1]} : vector<2x96xf32> to vector<2x32xf32>
    %190 = vector.extract_strided_slice %178 {offsets = [0, 64], sizes = [2, 32], strides = [1, 1]} : vector<2x96xf32> to vector<2x32xf32>
    %191 = vector.broadcast %7 : vector<1x32xf32> to vector<2x32xf32>
    %192 = arith.addf %190, %191 : vector<2x32xf32>
    %193 = arith.mulf %187, %192 : vector<2x32xf32>
    %194 = arith.addf %189, %193 : vector<2x32xf32>
    %195 = math.tanh %194 : vector<2x32xf32>
    %cst_33 = arith.constant 1.000000e+00 : f32
    %196 = vector.broadcast %cst_33 : f32 to vector<2x32xf32>
    %197 = arith.subf %196, %188 : vector<2x32xf32>
    %198 = arith.mulf %197, %195 : vector<2x32xf32>
    %199 = arith.mulf %188, %176 : vector<2x32xf32>
    %200 = arith.addf %198, %199 : vector<2x32xf32>
    %c0_34 = arith.constant 0 : index
    %c0_35 = arith.constant 0 : index
    %201 = vector.load %arg5[%c0_34, %c0_35] : memref<32x4xf32, #tpu.memory_space<vmem>>, vector<32x4xf32>
    %cst_36 = arith.constant dense<0.000000e+00> : vector<2x4xf32>
    %202 = tpu.matmul %200, %201, %cst_36 {dimension_numbers = #tpu.dot_dimension_numbers<[1], [0], [0], [1], [0, 0, 1, 1], [], []>} : vector<2x32xf32>, vector<32x4xf32>, vector<2x4xf32> -> vector<2x4xf32>
    %c0_37 = arith.constant 0 : index
    %c0_38 = arith.constant 0 : index
    %203 = vector.load %arg6[%c0_37, %c0_38] : memref<1x4xf32, #tpu.memory_space<vmem>>, vector<1x4xf32>
    %204 = vector.broadcast %203 : vector<1x4xf32> to vector<2x4xf32>
    %205 = arith.addf %202, %204 : vector<2x4xf32>
    %c0_39 = arith.constant 0 : index
    %c0_40 = arith.constant 0 : index
    %206 = vector.load %arg7[%c0_39, %c0_40] : memref<2x4xf32, #tpu.memory_space<vmem>>, vector<2x4xf32>
    tpu.vector_store %arg7[%c0_39, %c0_40], %205 {strides = array<i32>} : memref<2x4xf32, #tpu.memory_space<vmem>>, vector<2x4xf32>,
    return
  }
}

</mosaic_0001>

<bundles_post_ra>
// kernel: gru_weather_forward.1
= control target key start
LH: loop header
LB: loop body
LE: loop exit
PB: predicated region body
PF: predicated region fallthrough
CT: control target
= control target key end

     0   :  { %12 = vsyncpa [#allocation3], 0  ;;  %s1959_s0 = inlined_call_operand.hbm [shape: f32[16,4], index: 0, kind: input, shape index: {}]   ;;  %s1960_s1 = inlined_call_operand.hbm [shape: f32[4,96], index: 1, kind: input, shape index: {}]   ;;  %s1961_s2 = inlined_call_operand.hbm [shape: f32[32,96], index: 2, kind: input, shape index: {}]   ;;  %s1962_s3 = inlined_call_operand.hbm [shape: f32[1,96], index: 3, kind: input, shape index: {}]   ;;  %s1963_s4 = inlined_call_operand.hbm [shape: f32[1,32], index: 4, kind: input, shape index: {}]   ;;  %s1964_s5 = inlined_call_operand.hbm [shape: f32[32,4], index: 5, kind: input, shape index: {}]   ;;  %s1965_s6 = inlined_call_operand.hbm [shape: f32[1,4], index: 6, kind: input, shape index: {}]   ;;  %s1966_s7 = inlined_call_operand.hbm [shape: f32[2,4], index: 7, kind: output, shape index: {}]  }
   0x1   :  { %13 = vsyncpa [#allocation6], 0 }
   0x2   :  { %14 = vsyncpa [#allocation9], 0 }
   0x3   :  { %15 = vsyncpa [#allocation12], 0 }
   0x4   :  { %16 = vsyncpa [#allocation4], 0  ;;  %s1664_s24 = smov [#allocation5]   ;;  %s1665_s26 = smov [#allocation8]  }
   0x5   :  { %s35_s25 = sshll.u32 %s1664_s24, 4  ;;  %s57_s27 = sshll.u32 %s1665_s26, 4  ;;  %s36_s25 = int_to_ptr.vmem [resolvable:$true] %s35_s25  ;;  %s58_s27 = int_to_ptr.vmem [resolvable:$true] %s57_s27 }
   0x6   :  { %s1478_s30 = scalar_lea.hbm %s1960_s1, 64 }
   0x7   :  { %p1479_p0 = scmp.ne.s32.totalorder %s1960_s1, %s1478_s30  ;;  %p1482_p1 = scmp.lt.u32.totalorder %s1478_s30, %s1960_s1 }
   0x9   :  { %p1484_p2 = pnand %p1482_p1, %p1479_p0 }
   0xb   :  { %1487 = shalt.err (!%p1484_p2)
}
   0xc   :  { %s1488_s12 = scalar_lea.vmem %s36_s25, 64  ;;  %p1493_p4 = scmp.lt.s32.totalorder %s36_s25, %s36_s25 }
   0xd   :  { %p1489_p3 = scmp.ne.s32.totalorder %s36_s25, %s1488_s12  ;;  %p1494_p5 = scmp.lt.s32.totalorder %s1488_s12, %s1488_s12 }
   0xf   :  { %p1495_p6 = por %p1494_p5, %p1493_p4 }
  0x11   :  { %p1496_p7 = pnand %p1495_p6, %p1489_p3 }
  0x13   :  { %1499 = shalt.err (!%p1496_p7)
}
  0x14   :  { %38 = dma.hbm_to_vmem [thread:$0]  %s1960_s1, 64, %s36_s25, [#allocation6]  }
  0x15   :  { %s1500_s17 = scalar_lea.hbm %s1962_s3, 16 }
  0x16   :  { %p1501_p8 = scmp.ne.s32.totalorder %s1962_s3, %s1500_s17  ;;  %p1504_p9 = scmp.lt.u32.totalorder %s1500_s17, %s1962_s3 }
  0x18   :  { %p1506_p10 = pnand %p1504_p9, %p1501_p8 }
  0x1a   :  { %1509 = shalt.err (!%p1506_p10)
}
  0x1b   :  { %s1510_s22 = scalar_lea.vmem %s58_s27, 16  ;;  %s1514_s23 = scalar_lea.vmem %s58_s27, 32 }
  0x1c   :  { %p1511_p11 = scmp.ne.s32.totalorder %s58_s27, %s1510_s22  ;;  %p1515_p12 = scmp.lt.s32.totalorder %s58_s27, %s58_s27 }
  0x1d   :  { %p1516_p13 = scmp.lt.s32.totalorder %s1514_s23, %s1510_s22 }
  0x1f   :  { %p1517_p0 = por %p1516_p13, %p1515_p12 }
  0x21   :  { %p1518_p1 = pnand %p1517_p0, %p1511_p11 }
  0x23   :  { %1521 = shalt.err (!%p1518_p1)
}
  0x24   :  { %60 = dma.hbm_to_vmem [thread:$0]  %s1962_s3, 16, %s58_s27, [#allocation9]  }
  0x25   :  { %s1666_s25 = smov [#allocation11]   ;;  %s1667_s28 = smov [#allocation2]  }
  0x26   :  { %s76_s26 = sshll.u32 %s1666_s25, 4  ;;  %s22_s29 = sshll.u32 %s1667_s28, 4  ;;  %s77_s26 = int_to_ptr.vmem [resolvable:$true] %s76_s26  ;;  %s1743_s29 = int_to_ptr.vmem [resolvable:$true] %s22_s29 }
  0x27   :  { %s1522_s9 = scalar_lea.hbm %s1964_s5, 512 }
  0x28   :  { %p1523_p2 = scmp.ne.s32.totalorder %s1964_s5, %s1522_s9  ;;  %p1526_p3 = scmp.lt.u32.totalorder %s1522_s9, %s1964_s5 }
  0x2a   :  { %p1528_p4 = pnand %p1526_p3, %p1523_p2 }
  0x2c   :  { %1531 = shalt.err (!%p1528_p4)
}
  0x2d   :  { %s1532_s3 = scalar_lea.vmem %s77_s26, 512  ;;  %p1537_p6 = scmp.lt.s32.totalorder %s77_s26, %s77_s26 }
  0x2e   :  { %p1533_p5 = scmp.ne.s32.totalorder %s77_s26, %s1532_s3  ;;  %p1538_p7 = scmp.lt.s32.totalorder %s1532_s3, %s1532_s3 }
  0x30   :  { %p1539_p8 = por %p1538_p7, %p1537_p6 }
  0x32   :  { %p1540_p9 = pnand %p1539_p8, %p1533_p5 }
  0x34   :  { %1543 = shalt.err (!%p1540_p9)
}
  0x35   :  { %s1668_s27 = smov 128   ;;  %s1669_s14 = smov 8  }
  0x36   :  { %82 = dma.hbm_to_vmem [thread:$0]  %s1964_s5, 512, %s77_s26, [#allocation12], %s1668_s27, %s1668_s27, %s1669_s14  }
  0x37   :  { %s1544_s19 = scalar_lea.hbm %s1959_s0, 256 }
  0x38   :  { %p1545_p10 = scmp.ne.s32.totalorder %s1959_s0, %s1544_s19  ;;  %p1548_p11 = scmp.lt.u32.totalorder %s1544_s19, %s1959_s0 }
  0x3a   :  { %p1550_p12 = pnand %p1548_p11, %p1545_p10 }
  0x3c   :  { %1553 = shalt.err (!%p1550_p12)
}
  0x3d   :  { %s1554_s1 = scalar_lea.vmem %s1743_s29, 256  ;;  %p1559_p0 = scmp.lt.s32.totalorder %s1743_s29, %s1743_s29 }
  0x3e   :  { %p1555_p13 = scmp.ne.s32.totalorder %s1743_s29, %s1554_s1  ;;  %p1560_p1 = scmp.lt.s32.totalorder %s1554_s1, %s1554_s1 }
  0x40   :  { %p1561_p2 = por %p1560_p1, %p1559_p0 }
  0x42   :  { %p1562_p3 = pnand %p1561_p2, %p1555_p13 }
  0x44   :  { %1565 = shalt.err (!%p1562_p3)
}
  0x45   :  { %28 = dma.hbm_to_vmem [thread:$0]  %s1959_s0, 256, %s1743_s29, [#allocation3], %s1668_s27, %s1668_s27, %s1669_s14  }
  0x46   :  { %s1670_s25 = smov [#allocation7]   ;;  %s1671_s28 = smov [#allocation10]  }
  0x47   :  { %s44_s26 = sshll.u32 %s1670_s25, 4  ;;  %s67_s30 = sshll.u32 %s1671_s28, 4  ;;  %s45_s26 = int_to_ptr.vmem [resolvable:$true] %s44_s26  ;;  %s68_s30 = int_to_ptr.vmem [resolvable:$true] %s67_s30 }
  0x48   :  { %s1566_s10 = scalar_lea.hbm %s1961_s2, 512 }
  0x49   :  { %p1567_p4 = scmp.ne.s32.totalorder %s1961_s2, %s1566_s10  ;;  %p1570_p5 = scmp.lt.u32.totalorder %s1566_s10, %s1961_s2 }
  0x4b   :  { %p1572_p6 = pnand %p1570_p5, %p1567_p4 }
  0x4d   :  { %1575 = shalt.err (!%p1572_p6)
}
  0x4e   :  { %s1576_s0 = scalar_lea.vmem %s45_s26, 512  ;;  %p1581_p8 = scmp.lt.s32.totalorder %s45_s26, %s45_s26 }
  0x4f   :  { %p1577_p7 = scmp.ne.s32.totalorder %s45_s26, %s1576_s0  ;;  %p1582_p9 = scmp.lt.s32.totalorder %s1576_s0, %s1576_s0 }
  0x51   :  { %p1583_p10 = por %p1582_p9, %p1581_p8 }
  0x53   :  { %p1584_p11 = pnand %p1583_p10, %p1577_p7 }
  0x55   :  { %1587 = shalt.err (!%p1584_p11)
}
  0x56   :  { %50 = dma.hbm_to_vmem [thread:$0]  %s1961_s2, 512, %s45_s26, [#allocation6], %s1668_s27, %s1668_s27, %s1669_s14  }
  0x57   :  { %s1588_s18 = scalar_lea.hbm %s1963_s4, 16 }
  0x58   :  { %p1589_p12 = scmp.ne.s32.totalorder %s1963_s4, %s1588_s18  ;;  %p1592_p13 = scmp.lt.u32.totalorder %s1588_s18, %s1963_s4 }
  0x5a   :  { %p1594_p0 = pnand %p1592_p13, %p1589_p12 }
  0x5c   :  { %1597 = shalt.err (!%p1594_p0)
}
  0x5d   :  { %s1598_s23 = scalar_lea.vmem %s68_s30, 16  ;;  %s1602_s1 = scalar_lea.vmem %s68_s30, 32 }
  0x5e   :  { %p1599_p1 = scmp.ne.s32.totalorder %s68_s30, %s1598_s23  ;;  %p1603_p2 = scmp.lt.s32.totalorder %s68_s30, %s68_s30 }
  0x5f   :  { %p1604_p3 = scmp.lt.s32.totalorder %s1602_s1, %s1598_s23 }
  0x61   :  { %p1605_p4 = por %p1604_p3, %p1603_p2 }
  0x63   :  { %p1606_p5 = pnand %p1605_p4, %p1599_p1 }
  0x65   :  { %1609 = shalt.err (!%p1606_p5)
}
  0x66   :  { %70 = dma.hbm_to_vmem [thread:$0]  %s1963_s4, 16, %s68_s30, [#allocation9]  }
  0x67   :  { %s1672_s14 = smov [#allocation13]   ;;  %s1610_s26 = scalar_lea.hbm %s1965_s6, 16 }
  0x68   :  { %s89_s5 = sshll.u32 %s1672_s14, 4  ;;  %p1611_p6 = scmp.ne.s32.totalorder %s1965_s6, %s1610_s26  ;;  %s90_s5 = int_to_ptr.vmem [resolvable:$true] %s89_s5 }
  0x69   :  { %p1614_p7 = scmp.lt.u32.totalorder %s1610_s26, %s1965_s6 }
  0x6b   :  { %p1616_p8 = pnand %p1614_p7, %p1611_p6 }
  0x6d   :  { %1619 = shalt.err (!%p1616_p8)
}
  0x6e   :  { %s1620_s11 = scalar_lea.vmem %s90_s5, 16  ;;  %s1624_s4 = scalar_lea.vmem %s90_s5, 32 }
  0x6f   :  { %p1621_p9 = scmp.ne.s32.totalorder %s90_s5, %s1620_s11  ;;  %p1625_p10 = scmp.lt.s32.totalorder %s90_s5, %s90_s5 }
  0x70   :  { %p1626_p11 = scmp.lt.s32.totalorder %s1624_s4, %s1620_s11 }
  0x72   :  { %p1627_p12 = por %p1626_p11, %p1625_p10 }
  0x74   :  { %p1628_p13 = pnand %p1627_p12, %p1621_p9 }
  0x76   :  { %1631 = shalt.err (!%p1628_p13)
}
  0x77   :  { %92 = dma.hbm_to_vmem [thread:$0]  %s1965_s6, 16, %s90_s5, [#allocation12]  }
  0x78   :  { %1654 = dma.done.wait [#allocation3], 256  }
  0x79   :  { %1655 = vsyncadd [#allocation3], 4294967040 }
  0x7a   :  { %1656 = dma.done.wait [#allocation6], 576  }
  0x7b   :  { %1657 = vsyncadd [#allocation6], 4294966720 }
  0x7c   :  { %1658 = dma.done.wait [#allocation9], 32  }
  0x7d   :  { %1659 = vsyncadd [#allocation9], 4294967264 }
  0x7e   :  { %1660 = dma.done.wait [#allocation12], 528  }
  0x7f   :  { %1661 = vsyncadd [#allocation12], 4294966768  ;;  %v1673_v0 = vmov 0.0|0.0   ;;  %vm1674_vm0 = vmmov 0   ;;  %v1675_v1 = vmov 0.0   ;;  %vm131_vm1 = vcmask 1043456  }
  0x80   :  { %1361 = vmatprep.subr.bf16.mxu1 %v1673_v0  ;;  %1270 = vmatprep.mubr.msk.f32.mxu1 %vm1674_vm0, %v1675_v1  ;;  %vm124_vm2 = vcmask 31744   ;;  %v210_v2 = vld [vmem:[#allocation7] sm:$0xff]  ;;  %v211_v3 = vld [vmem:[#allocation7 + $0x8] sm:$0xff]  ;;  %v116_v4 = vld [vmem:[#allocation5] sm:$0xf]  ;;  %s1676_s6 = smov 64  }
  0x81   :  { %v1822_v5 = vpack.c.bf16 %v211_v3, %v210_v2  ;;  %1257 = vmatprep.subr.msk.mxu0 %vm131_vm1, %v116_v4  ;;  %v114_v6 = vld [vmem:[#allocation2] sm:$0xff]  ;;  %v115_v7 = vld [vmem:[#allocation2 + $0x8] sm:$0xff]  ;;  %v1192_v10 = vld [vmem:[#allocation10] ss:$0 sm:$0xff]  ;;  %s1677_s13 = smov 96   ;;  %vm215_vm3 = vcmask 261120  }
  0x82   :  { %v212_v8 = vld [vmem:[#allocation7 + $0x10] sm:$0xff]  ;;  %1258 = vmatpush3.msk.msra.mxu0 %vm131_vm1, %v116_v4  ;;  %1259 = vmatprep.mubr.msk.f32.mxu0 %vm124_vm2, %v114_v6  ;;  %v213_v9 = vld [vmem:[#allocation7 + $0x18] sm:$0xff]  ;;  %v1187_v13 = vld [vmem:[#allocation8] ss:$0 sm:$0xff]  ;;  %s1678_s3 = smov [#allocation14]   ;;  %vm1167_vm4 = vcmask 25600  }
  0x83   :  { %1363 = vmatpush3.bf16.msra.mxu1 %v1822_v5  ;;  %1260 = vmatmul.mubr.msk.f32.vlgmr.msra.gmra.mrb[0].mxu0 %vm124_vm2, %v115_v7  ;;  %v1825_v11 = vpack.c.bf16 %v213_v9, %v212_v8  ;;  %s1175_s0 = sshll.u32 %s1678_s3, 4  ;;  %s1176_s0 = int_to_ptr.vmem [resolvable:$true] %s1175_s0 }
  0x84   :  { %1364 = vmatprep.subr.bf16.mxu1 %v1673_v0  ;;  %301 = vrot.lane.b32.xlu0 %v1192_v10, %s1676_s6  ;;  %s1632_s29 = scalar_lea.vmem %s1176_s0, 32  ;;  %p1637_p1 = scmp.lt.s32.totalorder %s1176_s0, %s1176_s0 }
  0x85   :  { %1367 = vmatprep.subr.bf16.mxu0 %v1673_v0  ;;  %1281 = vmatprep.mubr.msk.f32.mxu0 %vm1674_vm0, %v1675_v1  ;;  %p1633_p0 = scmp.ne.s32.totalorder %s1176_s0, %s1632_s29  ;;  %p1638_p2 = scmp.lt.s32.totalorder %s1632_s29, %s1632_s29 }
  0x86   :  { %1369 = vmatpush3.bf16.msra.mxu0 %v1822_v5 }
  0x87   :  { %1366 = vmatpush3.bf16.msra.mxu1 %v1825_v11  ;;  %1370 = vmatprep.subr.bf16.mxu0 %v1673_v0  ;;  %p1639_p3 = por %p1638_p2, %p1637_p1 }
  0x88   :  { %1373 = vmatprep.subr.bf16.mxu1 %v1673_v0 }
  0x89   :  { %p1640_p4 = pnand %p1639_p3, %p1633_p0 }
  0x8a   :  { %1271 = vmatmul.mubr.f32.vlgmr.msra.gmra.mrb[0].mxu1 %v1675_v1  ;;  %1372 = vmatpush3.bf16.msra.mxu0 %v1825_v11 }
  0x8b   :  { %1375 = vmatpush3.bf16.msra.mxu1 %v1822_v5  ;;  %1292 = vmatprep.mubr.msk.f32.mxu1 %vm1674_vm0, %v1675_v1 }
  0x8c   :  { %1376 = vmatprep.subr.bf16.mxu1 %v1673_v0  ;;  %1379 = vmatprep.subr.bf16.mxu0 %v1673_v0 }
  0x8f   :  { %1378 = vmatpush3.bf16.msra.mxu1 %v1825_v11 }
  0x90   :  { %1385 = vmatprep.subr.bf16.mxu1 %v1673_v0 }
  0xf6   :  { %v1847_v16 = vpop.permute.xlu0 %301 }
 0x156   :  { %v1261_v12 = vpop.f32.mrb[0].mxu0 }
 0x157   :  { %v1845_v14 = vadd.f32 %v1261_v12, %v1187_v13  ;;  %v201_v15 = vpop.f32.mrb[1].mxu0 }
 0x158   :  { %v1851_v20 = vadd.f32 %v1187_v13, %v201_v15 }
 0x15d   :  { %v285_v17 = vpop.f32.mrb[0].mxu1 }
 0x15e   :  { %v304_v18 = vadd.f32 %v1847_v16, %v285_v17  ;;  %v1272_v19 = vpop.f32.mrb[1].mxu1  ;;  %v289_v21 = vadd.f32 %v285_v17, %v1851_v20 }
 0x160   :  { %306 = vrot.lane.b32.xlu0 %v304_v18, %s1676_s6  ;;  %v1191_v22 = vmul.f32 -1.442695, %v289_v21 }
 0x162   :  { %1430 = vpow2.f32 %v1191_v22 }
 0x16c   :  { %v1431_v23 = vpop.eup %1430 }
 0x16d   :  { %v293_v24 = vadd.f32 1.0, %v1431_v23 }
 0x16f   :  { %1432 = vrcp.f32 %v293_v24 }
 0x179   :  { %v1433_v25 = vpop.eup %1432 }
 0x17a   :  { %v316_v31 = vsub.f32 1.0, %v1433_v25  ;;  %v322_v33 = vmul.f32 0.0, %v1433_v25 }
 0x1d2   :  { %v307_v26 = vpop.permute.xlu0 %306 }
 0x1d3   :  { %v309_v27 = vmul.f32 %v1433_v25, %v307_v26 }
 0x1d5   :  { %311 = vrot.lane.b32.xlu1 %v309_v27, %s1676_s6 }
 0x247   :  { %v312_v28 = vpop.permute.xlu1 %311 }
 0x248   :  { %v314_v29 = vadd.f32 %v312_v28, %v1851_v20 }
 0x24a   :  { %1434 = vtanh.f32 %v314_v29 }
 0x254   :  { %v1435_v30 = vpop.eup %1434 }
 0x255   :  { %318 = vrot.lane.b32.xlu1 %v1435_v30, %s1677_s13 }
 0x2c7   :  { %v319_v32 = vpop.permute.xlu1 %318 }
 0x2c8   :  { %v321_v34 = vmul.f32 %v319_v32, %v316_v31 }
 0x2ca   :  { %v323_v35 = vadd.f32 %v322_v33, %v321_v34 }
 0x2cc   :  { %325 = vrot.lane.b32.xlu0 %v323_v35, %s1677_s13  ;;  %v428_v52 = vrot.slane %v323_v35, 6 }
 0x33e   :  { %v326_v36 = vpop.permute.xlu0 %325 }
 0x33f   :  { %1282 = vmatmul.mubr.msk.f32.vlgmr.msra.gmra.mrb[2].mxu0 %vm215_vm3, %v326_v36 }
 0x340   :  { %1381 = vmatpush3.bf16.msra.mxu0 %v1822_v5  ;;  %1303 = vmatprep.mubr.msk.f32.mxu0 %vm1674_vm0, %v1675_v1 }
 0x341   :  { %1382 = vmatprep.subr.bf16.mxu0 %v1673_v0 }
 0x344   :  { %1384 = vmatpush3.bf16.msra.mxu0 %v1825_v11 }
 0x345   :  { %1391 = vmatprep.subr.bf16.mxu0 %v1673_v0 }
 0x412   :  { %v395_v37 = vpop.f32.mrb[2].mxu0 }
 0x413   :  { %v409_v38 = vadd.f32 %v395_v37, %v1847_v16  ;;  %v1283_v39 = vpop.f32.mrb[3].mxu0  ;;  %v400_v41 = vrot.slane %v395_v37, 6 }
 0x415   :  { %v411_v40 = vrot.slane %v409_v38, 6  ;;  %v402_v42 = vadd.f32 %v400_v41, %v1851_v20 }
 0x417   :  { %412 = vrot.lane.b32.xlu1 %v411_v40, %s1676_s6  ;;  %v1194_v43 = vmul.f32 -1.442695, %v402_v42 }
 0x419   :  { %1436 = vpow2.f32 %v1194_v43 }
 0x423   :  { %v1437_v44 = vpop.eup %1436 }
 0x424   :  { %v406_v45 = vadd.f32 1.0, %v1437_v44 }
 0x426   :  { %1438 = vrcp.f32 %v406_v45 }
 0x430   :  { %v1439_v46 = vpop.eup %1438 }
 0x431   :  { %v422_v53 = vsub.f32 1.0, %v1439_v46  ;;  %v430_v56 = vmul.f32 %v1439_v46, %v428_v52 }
 0x489   :  { %v413_v47 = vpop.permute.xlu1 %412 }
 0x48a   :  { %v415_v48 = vmul.f32 %v1439_v46, %v413_v47 }
 0x48c   :  { %417 = vrot.lane.b32.xlu0 %v415_v48, %s1676_s6 }
 0x4fe   :  { %v418_v49 = vpop.permute.xlu0 %417 }
 0x4ff   :  { %v420_v50 = vadd.f32 %v418_v49, %v1851_v20 }
 0x501   :  { %1440 = vtanh.f32 %v420_v50 }
 0x50b   :  { %v1441_v51 = vpop.eup %1440 }
 0x50c   :  { %424 = vrot.lane.b32.xlu1 %v1441_v51, %s1677_s13 }
 0x57e   :  { %v425_v54 = vpop.permute.xlu1 %424 }
 0x57f   :  { %v427_v55 = vmul.f32 %v425_v54, %v422_v53 }
 0x581   :  { %v431_v57 = vadd.f32 %v430_v56, %v427_v55 }
 0x583   :  { %v433_v58 = vrot.slane %v431_v57, 2  ;;  %v537_v17 = vrot.slane %v431_v57, 6 }
 0x585   :  { %434 = vrot.lane.b32.xlu0 %v433_v58, %s1677_s13 }
 0x5f7   :  { %v435_v59 = vpop.permute.xlu0 %434 }
 0x5f8   :  { %1293 = vmatmul.mubr.msk.f32.vlgmr.msra.gmra.mrb[2].mxu1 %vm215_vm3, %v435_v59 }
 0x5f9   :  { %1387 = vmatpush3.bf16.msra.mxu1 %v1822_v5  ;;  %1314 = vmatprep.mubr.msk.f32.mxu1 %vm1674_vm0, %v1675_v1 }
 0x5fa   :  { %1388 = vmatprep.subr.bf16.mxu1 %v1673_v0 }
 0x5fd   :  { %1390 = vmatpush3.bf16.msra.mxu1 %v1825_v11 }
 0x5fe   :  { %1397 = vmatprep.subr.bf16.mxu1 %v1673_v0 }
 0x6cb   :  { %v504_v60 = vpop.f32.mrb[2].mxu1 }
 0x6cc   :  { %v518_v61 = vadd.f32 %v504_v60, %v1847_v16  ;;  %v1294_v62 = vpop.f32.mrb[3].mxu1  ;;  %v509_v2 = vrot.slane %v504_v60, 4 }
 0x6ce   :  { %v520_v63 = vrot.slane %v518_v61, 4  ;;  %v511_v3 = vadd.f32 %v509_v2, %v1851_v20 }
 0x6d0   :  { %521 = vrot.lane.b32.xlu1 %v520_v63, %s1676_s6  ;;  %v1196_v4 = vmul.f32 -1.442695, %v511_v3 }
 0x6d2   :  { %1442 = vpow2.f32 %v1196_v4 }
 0x6dc   :  { %v1443_v6 = vpop.eup %1442 }
 0x6dd   :  { %v515_v7 = vadd.f32 1.0, %v1443_v6 }
 0x6df   :  { %1444 = vrcp.f32 %v515_v7 }
 0x6e9   :  { %v1445_v8 = vpop.eup %1444 }
 0x6ea   :  { %v531_v18 = vsub.f32 1.0, %v1445_v8  ;;  %v539_v21 = vmul.f32 %v1445_v8, %v537_v17 }
 0x742   :  { %v522_v9 = vpop.permute.xlu1 %521 }
 0x743   :  { %v524_v10 = vmul.f32 %v1445_v8, %v522_v9 }
 0x745   :  { %526 = vrot.lane.b32.xlu0 %v524_v10, %s1676_s6 }
 0x7b7   :  { %v527_v12 = vpop.permute.xlu0 %526 }
 0x7b8   :  { %v529_v13 = vadd.f32 %v527_v12, %v1851_v20 }
 0x7ba   :  { %1446 = vtanh.f32 %v529_v13 }
 0x7c4   :  { %v1447_v15 = vpop.eup %1446 }
 0x7c5   :  { %533 = vrot.lane.b32.xlu1 %v1447_v15, %s1677_s13 }
 0x837   :  { %v534_v19 = vpop.permute.xlu1 %533 }
 0x838   :  { %v536_v22 = vmul.f32 %v534_v19, %v531_v18 }
 0x83a   :  { %v540_v23 = vadd.f32 %v539_v21, %v536_v22 }
 0x83c   :  { %v542_v24 = vrot.slane %v540_v23, 4  ;;  %v646_v41 = vrot.slane %v540_v23, 6 }
 0x83e   :  { %543 = vrot.lane.b32.xlu0 %v542_v24, %s1677_s13 }
 0x8b0   :  { %v544_v25 = vpop.permute.xlu0 %543 }
 0x8b1   :  { %1304 = vmatmul.mubr.msk.f32.vlgmr.msra.gmra.mrb[4].mxu0 %vm215_vm3, %v544_v25 }
 0x8b2   :  { %1393 = vmatpush3.bf16.msra.mxu0 %v1822_v5  ;;  %1325 = vmatprep.mubr.msk.f32.mxu0 %vm1674_vm0, %v1675_v1 }
 0x8b3   :  { %1394 = vmatprep.subr.bf16.mxu0 %v1673_v0 }
 0x8b6   :  { %1396 = vmatpush3.bf16.msra.mxu0 %v1825_v11 }
 0x8b7   :  { %1403 = vmatprep.subr.bf16.mxu0 %v1673_v0 }
 0x984   :  { %v613_v26 = vpop.f32.mrb[4].mxu0 }
 0x985   :  { %v627_v27 = vadd.f32 %v613_v26, %v1847_v16  ;;  %v1305_v28 = vpop.f32.mrb[5].mxu0  ;;  %v618_v30 = vrot.slane %v613_v26, 2 }
 0x987   :  { %v629_v29 = vrot.slane %v627_v27, 2  ;;  %v620_v31 = vadd.f32 %v618_v30, %v1851_v20 }
 0x989   :  { %630 = vrot.lane.b32.xlu1 %v629_v29, %s1676_s6  ;;  %v1198_v32 = vmul.f32 -1.442695, %v620_v31 }
 0x98b   :  { %1448 = vpow2.f32 %v1198_v32 }
 0x995   :  { %v1449_v33 = vpop.eup %1448 }
 0x996   :  { %v624_v34 = vadd.f32 1.0, %v1449_v33 }
 0x998   :  { %1450 = vrcp.f32 %v624_v34 }
 0x9a2   :  { %v1451_v35 = vpop.eup %1450 }
 0x9a3   :  { %v640_v42 = vsub.f32 1.0, %v1451_v35  ;;  %v648_v44 = vmul.f32 %v1451_v35, %v646_v41 }
 0x9fb   :  { %v631_v36 = vpop.permute.xlu1 %630 }
 0x9fc   :  { %v633_v37 = vmul.f32 %v1451_v35, %v631_v36 }
 0x9fe   :  { %635 = vrot.lane.b32.xlu0 %v633_v37, %s1676_s6 }
 0xa70   :  { %v636_v38 = vpop.permute.xlu0 %635 }
 0xa71   :  { %v638_v39 = vadd.f32 %v636_v38, %v1851_v20 }
 0xa73   :  { %1452 = vtanh.f32 %v638_v39 }
 0xa7d   :  { %v1453_v40 = vpop.eup %1452 }
 0xa7e   :  { %642 = vrot.lane.b32.xlu1 %v1453_v40, %s1677_s13 }
 0xaf0   :  { %v643_v43 = vpop.permute.xlu1 %642 }
 0xaf1   :  { %v645_v45 = vmul.f32 %v643_v43, %v640_v42 }
 0xaf3   :  { %v649_v46 = vadd.f32 %v648_v44, %v645_v45 }
 0xaf5   :  { %v651_v47 = vrot.slane %v649_v46, 6 }
 0xaf7   :  { %652 = vrot.lane.b32.xlu0 %v651_v47, %s1677_s13 }
 0xb69   :  { %v653_v48 = vpop.permute.xlu0 %652 }
 0xb6a   :  { %1315 = vmatmul.mubr.msk.f32.vlgmr.msra.gmra.mrb[4].mxu1 %vm215_vm3, %v653_v48 }
 0xb6b   :  { %1399 = vmatpush3.bf16.msra.mxu1 %v1822_v5  ;;  %1336 = vmatprep.mubr.msk.f32.mxu1 %vm1674_vm0, %v1675_v1 }
 0xb6c   :  { %1400 = vmatprep.subr.bf16.mxu1 %v1673_v0 }
 0xb6f   :  { %1402 = vmatpush3.bf16.msra.mxu1 %v1825_v11 }
 0xb70   :  { %1409 = vmatprep.subr.bf16.mxu1 %v1673_v0 }
 0xc3d   :  { %v722_v20 = vpop.f32.mrb[4].mxu1 }
 0xc3e   :  { %v733_v49 = vadd.f32 %v722_v20, %v1847_v16  ;;  %v1316_v50 = vpop.f32.mrb[5].mxu1  ;;  %v726_v51 = vadd.f32 %v722_v20, %v1845_v14 }
 0xc40   :  { %735 = vrot.lane.b32.xlu1 %v733_v49, %s1676_s6  ;;  %v1200_v52 = vmul.f32 -1.442695, %v726_v51 }
 0xc42   :  { %1454 = vpow2.f32 %v1200_v52 }
 0xc4c   :  { %v1455_v53 = vpop.eup %1454 }
 0xc4d   :  { %v730_v54 = vadd.f32 1.0, %v1455_v53 }
 0xc4f   :  { %1456 = vrcp.f32 %v730_v54 }
 0xc59   :  { %v1457_v55 = vpop.eup %1456 }
 0xc5a   :  { %v745_v61 = vsub.f32 1.0, %v1457_v55  ;;  %v752_v63 = vmul.f32 %v1457_v55, %v651_v47 }
 0xcb2   :  { %v736_v56 = vpop.permute.xlu1 %735 }
 0xcb3   :  { %v738_v57 = vmul.f32 %v1457_v55, %v736_v56 }
 0xcb5   :  { %740 = vrot.lane.b32.xlu0 %v738_v57, %s1676_s6 }
 0xd27   :  { %v741_v58 = vpop.permute.xlu0 %740 }
 0xd28   :  { %v743_v59 = vadd.f32 %v741_v58, %v1845_v14 }
 0xd2a   :  { %1458 = vtanh.f32 %v743_v59 }
 0xd34   :  { %v1459_v60 = vpop.eup %1458 }
 0xd35   :  { %747 = vrot.lane.b32.xlu1 %v1459_v60, %s1677_s13 }
 0xda7   :  { %v748_v62 = vpop.permute.xlu1 %747 }
 0xda8   :  { %v750_v2 = vmul.f32 %v748_v62, %v745_v61 }
 0xdaa   :  { %v753_v3 = vadd.f32 %v752_v63, %v750_v2 }
 0xdac   :  { %755 = vrot.lane.b32.xlu0 %v753_v3, %s1677_s13  ;;  %v858_v23 = vrot.slane %v753_v3, 6  ;;  %v1080_v3 = vld [vmem:[#allocation11] sm:$0xff] }
 0xe1e   :  { %v756_v4 = vpop.permute.xlu0 %755 }
 0xe1f   :  { %1326 = vmatmul.mubr.msk.f32.vlgmr.msra.gmra.mrb[6].mxu0 %vm215_vm3, %v756_v4  ;;  %v1081_v4 = vld [vmem:[#allocation11 + $0x8] sm:$0xff] }
 0xe20   :  { %1405 = vmatpush3.bf16.msra.mxu0 %v1822_v5  ;;  %1347 = vmatprep.mubr.msk.f32.mxu0 %vm1674_vm0, %v1675_v1 }
 0xe21   :  { %1406 = vmatprep.subr.bf16.mxu0 %v1673_v0 }
 0xe24   :  { %1408 = vmatpush3.bf16.msra.mxu0 %v1825_v11 }
 0xef2   :  { %v825_v6 = vpop.f32.mrb[6].mxu0 }
 0xef3   :  { %v839_v7 = vadd.f32 %v825_v6, %v1847_v16  ;;  %v1327_v8 = vpop.f32.mrb[7].mxu0  ;;  %v830_v10 = vrot.slane %v825_v6, 6  ;;  %v1082_v6 = vld [vmem:[#allocation11 + $0x10] sm:$0xff] }
 0xef4   :  { %v1083_v8 = vld [vmem:[#allocation11 + $0x18] sm:$0xff] }
 0xef5   :  { %v841_v9 = vrot.slane %v839_v7, 6  ;;  %v832_v12 = vadd.f32 %v830_v10, %v1845_v14  ;;  %v1410_v7 = vpack.c.bf16 %v1081_v4, %v1080_v3 }
 0xef7   :  { %842 = vrot.lane.b32.xlu1 %v841_v9, %s1676_s6  ;;  %v1202_v13 = vmul.f32 -1.442695, %v832_v12  ;;  %v1413_v9 = vpack.c.bf16 %v1083_v8, %v1082_v6 }
 0xef9   :  { %1460 = vpow2.f32 %v1202_v13 }
 0xf03   :  { %v1461_v5 = vpop.eup %1460 }
 0xf04   :  { %v836_v15 = vadd.f32 1.0, %v1461_v5 }
 0xf06   :  { %1462 = vrcp.f32 %v836_v15 }
 0xf10   :  { %v1463_v17 = vpop.eup %1462 }
 0xf11   :  { %v852_v24 = vsub.f32 1.0, %v1463_v17  ;;  %v860_v27 = vmul.f32 %v1463_v17, %v858_v23 }
 0xf69   :  { %v843_v18 = vpop.permute.xlu1 %842 }
 0xf6a   :  { %v845_v19 = vmul.f32 %v1463_v17, %v843_v18 }
 0xf6c   :  { %847 = vrot.lane.b32.xlu0 %v845_v19, %s1676_s6 }
 0xfde   :  { %v848_v11 = vpop.permute.xlu0 %847 }
 0xfdf   :  { %v850_v21 = vadd.f32 %v848_v11, %v1845_v14  ;;  %v1207_v11 = vld [vmem:[#allocation13] ss:$0 sm:$0xff] }
 0xfe1   :  { %1464 = vtanh.f32 %v850_v21 }
 0xfeb   :  { %v1465_v22 = vpop.eup %1464 }
 0xfec   :  { %854 = vrot.lane.b32.xlu1 %v1465_v22, %s1677_s13 }
0x105e   :  { %v855_v25 = vpop.permute.xlu1 %854 }
0x105f   :  { %v857_v26 = vmul.f32 %v855_v25, %v852_v24 }
0x1061   :  { %v861_v28 = vadd.f32 %v860_v27, %v857_v26 }
0x1063   :  { %v863_v29 = vrot.slane %v861_v28, 2  ;;  %v967_v45 = vrot.slane %v861_v28, 6 }
0x1065   :  { %864 = vrot.lane.b32.xlu0 %v863_v29, %s1677_s13 }
0x10d7   :  { %v865_v30 = vpop.permute.xlu0 %864 }
0x10d8   :  { %1337 = vmatmul.mubr.msk.f32.vlgmr.msra.gmra.mrb[6].mxu1 %vm215_vm3, %v865_v30 }
0x10d9   :  { %1358 = vmatprep.mubr.msk.f32.mxu1 %vm1674_vm0, %v1675_v1  ;;  %1411 = vmatpush3.bf16.msra.mxu1 %v1410_v7 }
0x10da   :  { %1412 = vmatprep.subr.bf16.mxu1 %v1673_v0 }
0x10dd   :  { %1414 = vmatpush3.bf16.msra.mxu1 %v1413_v9 }
0x11ab   :  { %v934_v31 = vpop.f32.mrb[6].mxu1 }
0x11ac   :  { %v948_v32 = vadd.f32 %v934_v31, %v1847_v16  ;;  %v1338_v33 = vpop.f32.mrb[7].mxu1  ;;  %v939_v35 = vrot.slane %v934_v31, 4 }
0x11ae   :  { %v950_v34 = vrot.slane %v948_v32, 4  ;;  %v941_v36 = vadd.f32 %v939_v35, %v1845_v14 }
0x11b0   :  { %951 = vrot.lane.b32.xlu1 %v950_v34, %s1676_s6  ;;  %v1204_v37 = vmul.f32 -1.442695, %v941_v36 }
0x11b2   :  { %1466 = vpow2.f32 %v1204_v37 }
0x11bc   :  { %v1467_v38 = vpop.eup %1466 }
0x11bd   :  { %v945_v39 = vadd.f32 1.0, %v1467_v38 }
0x11bf   :  { %1468 = vrcp.f32 %v945_v39 }
0x11c9   :  { %v1469_v40 = vpop.eup %1468 }
0x11ca   :  { %v961_v46 = vsub.f32 1.0, %v1469_v40  ;;  %v969_v48 = vmul.f32 %v1469_v40, %v967_v45 }
0x1222   :  { %v952_v41 = vpop.permute.xlu1 %951 }
0x1223   :  { %v954_v42 = vmul.f32 %v1469_v40, %v952_v41 }
0x1225   :  { %956 = vrot.lane.b32.xlu0 %v954_v42, %s1676_s6 }
0x1297   :  { %v957_v1 = vpop.permute.xlu0 %956 }
0x1298   :  { %v959_v43 = vadd.f32 %v957_v1, %v1845_v14 }
0x129a   :  { %1470 = vtanh.f32 %v959_v43 }
0x12a4   :  { %v1471_v44 = vpop.eup %1470 }
0x12a5   :  { %963 = vrot.lane.b32.xlu1 %v1471_v44, %s1677_s13 }
0x1317   :  { %v964_v47 = vpop.permute.xlu1 %963 }
0x1318   :  { %v966_v20 = vmul.f32 %v964_v47, %v961_v46 }
0x131a   :  { %v970_v49 = vadd.f32 %v969_v48, %v966_v20 }
0x131c   :  { %v972_v50 = vrot.slane %v970_v49, 4  ;;  %v1076_v12 = vrot.slane %v970_v49, 6 }
0x131e   :  { %973 = vrot.lane.b32.xlu0 %v972_v50, %s1677_s13 }
0x1390   :  { %v974_v51 = vpop.permute.xlu0 %973 }
0x1391   :  { %1348 = vmatmul.mubr.msk.f32.vlgmr.msra.gmra.mrb[8].mxu0 %vm215_vm3, %v974_v51 }
0x1464   :  { %v1043_v52 = vpop.f32.mrb[8].mxu0 }
0x1465   :  { %v1057_v53 = vadd.f32 %v1043_v52, %v1847_v16  ;;  %v1349_v54 = vpop.f32.mrb[9].mxu0  ;;  %v1048_v56 = vrot.slane %v1043_v52, 2 }
0x1467   :  { %v1059_v55 = vrot.slane %v1057_v53, 2  ;;  %v1050_v57 = vadd.f32 %v1048_v56, %v1845_v14 }
0x1469   :  { %1060 = vrot.lane.b32.xlu1 %v1059_v55, %s1676_s6  ;;  %v1206_v58 = vmul.f32 -1.442695, %v1050_v57 }
0x146b   :  { %1472 = vpow2.f32 %v1206_v58 }
0x1475   :  { %v1473_v59 = vpop.eup %1472 }
0x1476   :  { %v1054_v60 = vadd.f32 1.0, %v1473_v59 }
0x1478   :  { %1474 = vrcp.f32 %v1054_v60 }
0x1482   :  { %v1475_v61 = vpop.eup %1474 }
0x1483   :  { %v1070_v13 = vsub.f32 1.0, %v1475_v61  ;;  %v1078_v15 = vmul.f32 %v1475_v61, %v1076_v12 }
0x14db   :  { %v1061_v62 = vpop.permute.xlu1 %1060 }
0x14dc   :  { %v1063_v63 = vmul.f32 %v1475_v61, %v1061_v62 }
0x14de   :  { %1065 = vrot.lane.b32.xlu0 %v1063_v63, %s1676_s6 }
0x1550   :  { %v1066_v2 = vpop.permute.xlu0 %1065 }
0x1551   :  { %v1068_v16 = vadd.f32 %v1066_v2, %v1845_v14 }
0x1553   :  { %1476 = vtanh.f32 %v1068_v16 }
0x155d   :  { %v1477_v10 = vpop.eup %1476 }
0x155e   :  { %1072 = vrot.lane.b32.xlu1 %v1477_v10, %s1677_s13 }
0x15d0   :  { %v1073_v5 = vpop.permute.xlu1 %1072 }
0x15d1   :  { %v1075_v17 = vmul.f32 %v1073_v5, %v1070_v13 }
0x15d3   :  { %v1079_v14 = vadd.f32 %v1078_v15, %v1075_v17 }
0x15d5   :  { %v1092_v18 = vrot.slane %v1079_v14, 6 }
0x15d7   :  { %1093 = vrot.lane.b32.xlu0 %v1092_v18, %s1677_s13 }
0x1649   :  { %v1094_v19 = vpop.permute.xlu0 %1093 }
0x164a   :  { %1359 = vmatmul.mubr.msk.f32.vlgmr.msra.gmra.mrb[8].mxu1 %vm215_vm3, %v1094_v19 }
0x171d   :  { %v1163_v0 = vpop.f32.mrb[8].mxu1 }
0x171e   :  { %v1164_v21 = vadd.f32 %v1207_v11, %v1163_v0  ;;  %v1360_v22 = vpop.f32.mrb[9].mxu1 }
0x1720   :  { %1168 = vst.msk [vmem:[#allocation14] sm:$0x3] %vm1167_vm4, %v1164_v21 }
0x1721   :  { %1643 = shalt.err (!%p1640_p4)
}
0x1722   :  { %s1644_s17 = scalar_lea.hbm %s1966_s7, 32 }
0x1723   :  { %p1645_p5 = scmp.ne.s32.totalorder %s1966_s7, %s1644_s17  ;;  %p1648_p6 = scmp.lt.u32.totalorder %s1644_s17, %s1966_s7 }
0x1725   :  { %p1650_p7 = pnand %p1648_p6, %p1645_p5 }
0x1727   :  { %1653 = shalt.err (!%p1650_p7)
}
0x1728   :  { %1178 = dma.vmem_to_hbm [thread:$0]  %s1176_s0, 32, %s1966_s7, [#allocation4]  }
0x1729   :  { %1662 = dma.done.wait [#allocation4], 32  }
0x172a   :  { %1663 = vsyncadd [#allocation4], 4294967264 }
0x172b   :  { %1182 = vsyncpa [#allocation3], 1 }
0x172c   :  { %1183 = vsyncpa [#allocation6], 1 }
0x172d   :  { %1184 = vsyncpa [#allocation9], 1 }
0x172e   :  { %1185 = vsyncpa [#allocation12], 1 }
0x172f   :  { %1186 = vsyncpa [#allocation4], 1 }

</bundles_post_ra>
